<compile_context>
chip_gen: v7x
topology: tpu7x:2x2x1
jax: 0.10.0
libtpu: 0.0.40
codegen_flags: <defaults>
</compile_context>

<pallas_src>
import functools

import jax
import jax.numpy as jnp
from jax.experimental import pallas as pl
from jax.experimental.pallas import tpu as pltpu

_HI = jax.lax.Precision.HIGHEST


def _round_up(v, m):
    return ((v + m - 1) // m) * m


def _largest_divisor_leq(n, cap):
    cap = max(1, min(n, cap))
    for d in range(cap, 0, -1):
        if n % d == 0:
            return d
    return 1


# --------------------------------------------------------------------------
# Pass 1: per-channel sum / sum-of-squares of conv1(x) (no bias).
# Outputs are per-batch-block partial sums: resident across the spatial axis
# ("arbitrary"), independent across the batch-block axis ("parallel").
# Padded spatial lanes are zero and contribute nothing (no bias, no mask).
# --------------------------------------------------------------------------
def bn_stats_kernel(x_ref, w1t_ref, sum_ref, sumsq_ref, *, nb):
    s = pl.program_id(1)

    @pl.when(s == 0)
    def _():
        sum_ref[...] = jnp.zeros_like(sum_ref)
        sumsq_ref[...] = jnp.zeros_like(sumsq_ref)

    w1t = w1t_ref[...]                                   # (Cmid, Cin)
    cmid = w1t.shape[0]
    zero = jnp.zeros((cmid, 1), jnp.float32)

    def body(i, carry):
        acc_s, acc_q = carry
        y = jnp.dot(w1t, x_ref[i], precision=_HI,
                    preferred_element_type=jnp.float32)  # (Cmid, tile_s)
        acc_s = acc_s + jnp.sum(y, axis=1, keepdims=True)
        acc_q = acc_q + jnp.sum(y * y, axis=1, keepdims=True)
        return (acc_s, acc_q)

    acc_s, acc_q = jax.lax.fori_loop(0, nb, body, (zero, zero), unroll=True)
    sum_ref[0] += acc_s
    sumsq_ref[0] += acc_q


# --------------------------------------------------------------------------
# Pass 2: fused conv1(+folded BN) + ReLU + merged [conv2 | pred] + sigmoid
# gate.  Single lane-dense (nb, Cout+1, tile_s) output per step: rows
# 0..Cout-1 = gated features, row Cout = raw pred map.
# --------------------------------------------------------------------------
def conv_idc_kernel(x_ref, w1f_ref, c1_ref, w2f_ref, b2f_ref, out_ref,
                    *, nb, out_ch, status):
    w1f = w1f_ref[...]                                   # (Cmid, Cin)
    c1 = c1_ref[...]                                     # (Cmid, 1)
    w2f = w2f_ref[...]                                   # (Cout+1, Cmid)
    b2f = b2f_ref[...]                                   # (Cout+1, 1)

    def body(i, _):
        x = x_ref[i]                                     # (Cin, tile_s)
        h = jnp.dot(w1f, x, precision=_HI,
                    preferred_element_type=jnp.float32) + c1
        h = jnp.maximum(h, 0.0)                          # (Cmid, tile_s)
        z = jnp.dot(w2f, h, precision=_HI,
                    preferred_element_type=jnp.float32) + b2f  # (Cout+1, tile_s)
        if status:
            pred = z[out_ch:out_ch + 1, :]               # (1, tile_s)
            row = jax.lax.broadcasted_iota(jnp.int32, z.shape, 0)
            gate = jnp.where(row < out_ch, jax.nn.sigmoid(pred), 1.0)
            z = z * gate                                 # pred row stays raw
        out_ref[i] = z
        return 0

    jax.lax.fori_loop(0, nb, body, 0, unroll=True)


# --------------------------------------------------------------------------
# Wrapper
# --------------------------------------------------------------------------
def conv_idc_block(x_nchw, params, *, status=True, eps=1e-5,
                   vmem_limit_bytes=48 * 1024 * 1024,
                   max_lanes_per_step=32768):
    N, Cin, H, W = x_nchw.shape
    S = H * W
    x3 = x_nchw.reshape(N, Cin, S).astype(jnp.float32)   # free reshape

    w1 = params["w1"].astype(jnp.float32)                # (Cin, Cmid)
    gamma = params["bn1_gamma"].astype(jnp.float32)
    beta = params["bn1_beta"].astype(jnp.float32)
    w2 = params["w2"].astype(jnp.float32)                # (Cmid, Cout)
    b2 = params["b2"].astype(jnp.float32)                # (Cout,)
    wp = params["wp"].astype(jnp.float32)                # (Cmid, 1)
    bp = params["bp"].astype(jnp.float32)                # (1,)
    Cmid = w1.shape[1]
    Cout = w2.shape[1]

    # ---- tile sizing from the VMEM budget ----
    # Per grid step: double-buffered x tile + double-buffered fused output
    # tile + single-buffered intermediates (h, z), all f32.
    bytes_per_lane = 4 * (2 * (Cin + Cout + 1) + Cmid + (Cout + 1))
    budget = vmem_limit_bytes // 2                        # headroom for weights etc.
    max_lanes = budget // bytes_per_lane
    max_lanes = max(128, min(max_lanes_per_step, (max_lanes // 128) * 128))

    S128 = _round_up(S, 128)
    grid_s = pl.cdiv(S128, min(S128, max_lanes))
    tile_s = _round_up(pl.cdiv(S128, grid_s), 128)
    S_pad = grid_s * tile_s

    nb = 1
    if grid_s == 1:                                       # small images: block N too
        nb = _largest_divisor_leq(N, max(1, max_lanes // tile_s))
    grid_n = N // nb

    if S_pad != S:
        x3 = jnp.pad(x3, ((0, 0), (0, 0), (0, S_pad - S)))

    cparams_stats = pltpu.CompilerParams(
        dimension_semantics=("parallel", "arbitrary"),
        vmem_limit_bytes=vmem_limit_bytes)
    cparams_main = pltpu.CompilerParams(
        dimension_semantics=("parallel", "parallel"),
        vmem_limit_bytes=vmem_limit_bytes)

    # ---------------- pass 1: BN batch statistics ----------------
    w1t = w1.T                                            # (Cmid, Cin)
    sum_p, sumsq_p = pl.pallas_call(
        functools.partial(bn_stats_kernel, nb=nb),
        out_shape=(jax.ShapeDtypeStruct((grid_n, Cmid, 1), jnp.float32),
                   jax.ShapeDtypeStruct((grid_n, Cmid, 1), jnp.float32)),
        grid=(grid_n, grid_s),
        in_specs=[pl.BlockSpec((nb, Cin, tile_s), lambda n, s: (n, 0, s)),
                  pl.BlockSpec((Cmid, Cin), lambda n, s: (0, 0))],
        out_specs=(pl.BlockSpec((1, Cmid, 1), lambda n, s: (n, 0, 0)),
                   pl.BlockSpec((1, Cmid, 1), lambda n, s: (n, 0, 0))),
        compiler_params=cparams_stats,
    )(x3, w1t)

    sum_y = jnp.sum(sum_p, axis=0)[:, 0]                  # (Cmid,)
    sumsq_y = jnp.sum(sumsq_p, axis=0)[:, 0]              # (Cmid,)

    M = N * S
    mean_lin = sum_y / M                                  # E[x@w1] (no bias)
    var_y = jnp.maximum(sumsq_y / M - mean_lin ** 2, 0.0)  # bias-invariant
    s1 = gamma / jnp.sqrt(var_y + eps)
    # BN(x@w1 + b1) = s1*(x@w1) + (beta - s1*mean_lin)   (b1 cancels exactly)
    c1 = (beta - s1 * mean_lin).reshape(Cmid, 1)

    # Fold BN scale into conv1 weights; merge wp into w2 (one MXU pass/tile).
    w1f = w1t * s1[:, None]                               # (Cmid, Cin)
    w2f = jnp.concatenate([w2, wp], axis=1).T             # (Cout+1, Cmid)
    b2f = jnp.concatenate([b2, bp])[:, None]              # (Cout+1, 1)

    # ---------------- pass 2: fused block ----------------
    fused = pl.pallas_call(
        functools.partial(conv_idc_kernel, nb=nb, out_ch=Cout, status=status),
        out_shape=jax.ShapeDtypeStruct((N, Cout + 1, S_pad), jnp.float32),
        grid=(grid_n, grid_s),
        in_specs=[pl.BlockSpec((nb, Cin, tile_s), lambda n, s: (n, 0, s)),
                  pl.BlockSpec((Cmid, Cin), lambda n, s: (0, 0)),
                  pl.BlockSpec((Cmid, 1), lambda n, s: (0, 0)),
                  pl.BlockSpec((Cout + 1, Cmid), lambda n, s: (0, 0)),
                  pl.BlockSpec((Cout + 1, 1), lambda n, s: (0, 0))],
        out_specs=pl.BlockSpec((nb, Cout + 1, tile_s), lambda n, s: (n, 0, s)),
        compiler_params=cparams_main,
    )(x3, w1f, c1, w2f, b2f)

    output = fused[:, :Cout, :S].reshape(N, Cout, H, W)
    pred_map = fused[:, Cout:, :S].reshape(N, 1, H, W)
    return output, pred_map


# --------------------------------------------------------------------------
# Pure-JAX reference (same math, NCHW layout, explicit highest precision)
# --------------------------------------------------------------------------
def _reference(x_nchw, params, *, status=True, eps=1e-5):
    N, Cin, H, W = x_nchw.shape
    x = x_nchw.reshape(N, Cin, H * W).astype(jnp.float32)

    y = jnp.einsum("ncs,cm->nms", x, params["w1"], precision=_HI)
    y = y + params["b1"][None, :, None]
    mean = jnp.mean(y, axis=(0, 2), keepdims=True)
    var = jnp.mean((y - mean) ** 2, axis=(0, 2), keepdims=True)
    h = (params["bn1_gamma"][None, :, None] * (y - mean)
         / jnp.sqrt(var + eps) + params["bn1_beta"][None, :, None])
    h = jnp.maximum(h, 0.0)

    pred = jnp.einsum("nms,mo->nos", h, params["wp"], precision=_HI)
    pred = pred + params["bp"][None, :, None]
    feat = jnp.einsum("nms,mo->nos", h, params["w2"], precision=_HI)
    feat = feat + params["b2"][None, :, None]
    if status:
        feat = feat * jax.nn.sigmoid(pred)

    Cout = params["w2"].shape[1]
    return feat.reshape(N, Cout, H, W), pred.reshape(N, 1, H, W)


def init_params(key, in_ch, mid_ch, out_ch):
    ks = jax.random.split(key, 6)
    return {
        "w1": jax.random.normal(ks[0], (in_ch, mid_ch), jnp.float32) * 0.5,
        "b1": jax.random.normal(ks[1], (mid_ch,), jnp.float32) * 0.1,
        "bn1_gamma": jnp.ones((mid_ch,), jnp.float32),
        "bn1_beta": jnp.zeros((mid_ch,), jnp.float32),
        "w2": jax.random.normal(ks[2], (mid_ch, out_ch), jnp.float32) * 0.3,
        "b2": jax.random.normal(ks[3], (out_ch,), jnp.float32) * 0.1,
        "wp": jax.random.normal(ks[4], (mid_ch, 1), jnp.float32) * 0.3,
        "bp": jax.random.normal(ks[5], (1,), jnp.float32) * 0.1,
    }


if __name__ == "__main__":
    key = jax.random.PRNGKey(0)
    k_x, k_p = jax.random.split(key)

    N, in_ch, mid_ch, out_ch, H, W = 2, 4, 8, 8, 16, 16
    x = jax.random.normal(k_x, (N, in_ch, H, W), jnp.float32)
    params = init_params(k_p, in_ch, mid_ch, out_ch)

    fn = jax.jit(functools.partial(conv_idc_block, status=True))
    out, pred_map = fn(x, params)
    out = jax.block_until_ready(out)
    pred_map = jax.block_until_ready(pred_map)

    ref_out, ref_pred = _reference(x, params, status=True)
    assert out.shape == (N, out_ch, H, W)
    assert pred_map.shape == (N, 1, H, W)
    assert jnp.allclose(out, ref_out, atol=5e-3, rtol=5e-3)
    assert jnp.allclose(pred_map, ref_pred, atol=5e-3, rtol=5e-3)

    print("KERNEL_OK")
</pallas_src>

<mosaic_0001>
module attributes {stable_mosaic.version = 11 : i64} {
  func.func @bn_stats_kernel(%arg0: i32, %arg1: i32, %arg2: memref<2x4x256xf32, #tpu.memory_space<vmem>>, %arg3: memref<8x4xf32, #tpu.memory_space<vmem>>, %arg4: memref<1x8x1xf32, #tpu.memory_space<vmem>>, %arg5: memref<1x8x1xf32, #tpu.memory_space<vmem>>) attributes {dimension_semantics = [#tpu.dimension_semantics<parallel>, #tpu.dimension_semantics<arbitrary>], iteration_bounds = array<i64: 1, 1>, scalar_prefetch = 0 : i64, scratch_operands = 0 : i64, tpu.core_type = #tpu.core_type<tc>, window_params = [{transform_indices = @transform_0, window_bounds = array<i64: 2, 4, 256>}, {pipeline_mode = #tpu.pipeline_mode<synchronous>, transform_indices = @transform_1, window_bounds = array<i64: 8, 4>}, {transform_indices = @transform_2, window_bounds = array<i64: 1, 8, 1>}, {transform_indices = @transform_3, window_bounds = array<i64: 1, 8, 1>}]} {
    %c0_i32 = arith.constant 0 : i32
    %0 = arith.cmpi eq, %arg1, %c0_i32 : i32
    %1 = arith.extui %0 : i1 to i32
    %c0_i32_0 = arith.constant 0 : i32
    %2 = arith.cmpi ne, %1, %c0_i32_0 : i32
    scf.if %2 {
      %cst_25 = arith.constant 0.000000e+00 : f32
      %39 = vector.broadcast %cst_25 : f32 to vector<1x8x1xf32>
      %c0_26 = arith.constant 0 : index
      %c0_27 = arith.constant 0 : index
      %c0_28 = arith.constant 0 : index
      %40 = vector.load %arg4[%c0_26, %c0_27, %c0_28] : memref<1x8x1xf32, #tpu.memory_space<vmem>>, vector<1x8x1xf32>
      tpu.vector_store %arg4[%c0_26, %c0_27, %c0_28], %39 {strides = array<i32>} : memref<1x8x1xf32, #tpu.memory_space<vmem>>, vector<1x8x1xf32>,
      %cst_29 = arith.constant 0.000000e+00 : f32
      %41 = vector.broadcast %cst_29 : f32 to vector<1x8x1xf32>
      %c0_30 = arith.constant 0 : index
      %c0_31 = arith.constant 0 : index
      %c0_32 = arith.constant 0 : index
      %42 = vector.load %arg5[%c0_30, %c0_31, %c0_32] : memref<1x8x1xf32, #tpu.memory_space<vmem>>, vector<1x8x1xf32>
      tpu.vector_store %arg5[%c0_30, %c0_31, %c0_32], %41 {strides = array<i32>} : memref<1x8x1xf32, #tpu.memory_space<vmem>>, vector<1x8x1xf32>,
    } else {
    }
    %c0 = arith.constant 0 : index
    %c0_1 = arith.constant 0 : index
    %3 = vector.load %arg3[%c0, %c0_1] : memref<8x4xf32, #tpu.memory_space<vmem>>, vector<8x4xf32>
    %cst = arith.constant 0.000000e+00 : f32
    %4 = vector.broadcast %cst : f32 to vector<8x1xf32>
    %c0_i32_2 = arith.constant 0 : i32
    %5 = arith.index_cast %c0_i32_2 : i32 to index
    %c0_3 = arith.constant 0 : index
    %c0_4 = arith.constant 0 : index
    %6 = vector.load %arg2[%5, %c0_3, %c0_4] : memref<2x4x256xf32, #tpu.memory_space<vmem>>, vector<1x4x256xf32>
    %7 = vector.shape_cast %6 : vector<1x4x256xf32> to vector<4x256xf32>
    %cst_5 = arith.constant dense<0.000000e+00> : vector<8x256xf32>
    %8 = tpu.matmul %3, %7, %cst_5 {dimension_numbers = #tpu.dot_dimension_numbers<[1], [0], [0], [1], [0, 0, 1, 1], [], []>, precision = #tpu.contract_precision<fp32>} : vector<8x4xf32>, vector<4x256xf32>, vector<8x256xf32> -> vector<8x256xf32>
    %cst_6 = arith.constant dense<0.000000e+00> : vector<8xf32>
    %9 = vector.multi_reduction <add>, %8, %cst_6 [1] : vector<8x256xf32> to vector<8xf32>
    %10 = vector.shape_cast %9 : vector<8xf32> to vector<8x1xf32>
    %11 = arith.addf %4, %10 : vector<8x1xf32>
    %12 = arith.mulf %8, %8 : vector<8x256xf32>
    %cst_7 = arith.constant dense<0.000000e+00> : vector<8xf32>
    %13 = vector.multi_reduction <add>, %12, %cst_7 [1] : vector<8x256xf32> to vector<8xf32>
    %14 = vector.shape_cast %13 : vector<8xf32> to vector<8x1xf32>
    %15 = arith.addf %4, %14 : vector<8x1xf32>
    %c1_i32 = arith.constant 1 : i32
    %16 = arith.index_cast %c1_i32 : i32 to index
    %c0_8 = arith.constant 0 : index
    %c0_9 = arith.constant 0 : index
    %17 = vector.load %arg2[%16, %c0_8, %c0_9] : memref<2x4x256xf32, #tpu.memory_space<vmem>>, vector<1x4x256xf32>
    %18 = vector.shape_cast %17 : vector<1x4x256xf32> to vector<4x256xf32>
    %cst_10 = arith.constant dense<0.000000e+00> : vector<8x256xf32>
    %19 = tpu.matmul %3, %18, %cst_10 {dimension_numbers = #tpu.dot_dimension_numbers<[1], [0], [0], [1], [0, 0, 1, 1], [], []>, precision = #tpu.contract_precision<fp32>} : vector<8x4xf32>, vector<4x256xf32>, vector<8x256xf32> -> vector<8x256xf32>
    %cst_11 = arith.constant dense<0.000000e+00> : vector<8xf32>
    %20 = vector.multi_reduction <add>, %19, %cst_11 [1] : vector<8x256xf32> to vector<8xf32>
    %21 = vector.shape_cast %20 : vector<8xf32> to vector<8x1xf32>
    %22 = arith.addf %11, %21 : vector<8x1xf32>
    %23 = arith.mulf %19, %19 : vector<8x256xf32>
    %cst_12 = arith.constant dense<0.000000e+00> : vector<8xf32>
    %24 = vector.multi_reduction <add>, %23, %cst_12 [1] : vector<8x256xf32> to vector<8xf32>
    %25 = vector.shape_cast %24 : vector<8xf32> to vector<8x1xf32>
    %26 = arith.addf %15, %25 : vector<8x1xf32>
    %c2_i32 = arith.constant 2 : i32
    %c0_13 = arith.constant 0 : index
    %c0_14 = arith.constant 0 : index
    %c0_15 = arith.constant 0 : index
    %27 = vector.load %arg4[%c0_13, %c0_14, %c0_15] : memref<1x8x1xf32, #tpu.memory_space<vmem>>, vector<1x8x1xf32>
    %28 = vector.shape_cast %27 : vector<1x8x1xf32> to vector<8x1xf32>
    %29 = arith.addf %28, %22 : vector<8x1xf32>
    %c0_16 = arith.constant 0 : index
    %c0_17 = arith.constant 0 : index
    %c0_18 = arith.constant 0 : index
    %30 = vector.load %arg4[%c0_16, %c0_17, %c0_18] : memref<1x8x1xf32, #tpu.memory_space<vmem>>, vector<1x8x1xf32>
    %31 = vector.shape_cast %30 : vector<1x8x1xf32> to vector<8x1xf32>
    %32 = vector.shape_cast %29 : vector<8x1xf32> to vector<1x8x1xf32>
    tpu.vector_store %arg4[%c0_16, %c0_17, %c0_18], %32 {strides = array<i32>} : memref<1x8x1xf32, #tpu.memory_space<vmem>>, vector<1x8x1xf32>,
    %c0_19 = arith.constant 0 : index
    %c0_20 = arith.constant 0 : index
    %c0_21 = arith.constant 0 : index
    %33 = vector.load %arg5[%c0_19, %c0_20, %c0_21] : memref<1x8x1xf32, #tpu.memory_space<vmem>>, vector<1x8x1xf32>
    %34 = vector.shape_cast %33 : vector<1x8x1xf32> to vector<8x1xf32>
    %35 = arith.addf %34, %26 : vector<8x1xf32>
    %c0_22 = arith.constant 0 : index
    %c0_23 = arith.constant 0 : index
    %c0_24 = arith.constant 0 : index
    %36 = vector.load %arg5[%c0_22, %c0_23, %c0_24] : memref<1x8x1xf32, #tpu.memory_space<vmem>>, vector<1x8x1xf32>
    %37 = vector.shape_cast %36 : vector<1x8x1xf32> to vector<8x1xf32>
    %38 = vector.shape_cast %35 : vector<8x1xf32> to vector<1x8x1xf32>
    tpu.vector_store %arg5[%c0_22, %c0_23, %c0_24], %38 {strides = array<i32>} : memref<1x8x1xf32, #tpu.memory_space<vmem>>, vector<1x8x1xf32>,
    return
  }
  func.func @transform_0(%arg0: i32, %arg1: i32) -> (i32, i32, i32) {
    %c0_i32 = arith.constant 0 : i32
    %c0_i32_0 = arith.constant 0 : i32
    return %arg0, %c0_i32, %arg1 : i32, i32, i32
  }
  func.func @transform_1(%arg0: i32, %arg1: i32) -> (i32, i32) {
    %c0_i32 = arith.constant 0 : i32
    %c0_i32_0 = arith.constant 0 : i32
    %c0_i32_1 = arith.constant 0 : i32
    return %c0_i32, %c0_i32_0 : i32, i32
  }
  func.func @transform_2(%arg0: i32, %arg1: i32) -> (i32, i32, i32) {
    %c0_i32 = arith.constant 0 : i32
    %c0_i32_0 = arith.constant 0 : i32
    %c0_i32_1 = arith.constant 0 : i32
    return %arg0, %c0_i32, %c0_i32_0 : i32, i32, i32
  }
  func.func @transform_3(%arg0: i32, %arg1: i32) -> (i32, i32, i32) {
    %c0_i32 = arith.constant 0 : i32
    %c0_i32_0 = arith.constant 0 : i32
    %c0_i32_1 = arith.constant 0 : i32
    return %arg0, %c0_i32, %c0_i32_0 : i32, i32, i32
  }
}

module attributes {stable_mosaic.version = 11 : i64} {
  func.func @conv_idc_kernel(%arg0: i32, %arg1: i32, %arg2: memref<2x4x256xf32, #tpu.memory_space<vmem>>, %arg3: memref<8x4xf32, #tpu.memory_space<vmem>>, %arg4: memref<8x1xf32, #tpu.memory_space<vmem>>, %arg5: memref<9x8xf32, #tpu.memory_space<vmem>>, %arg6: memref<9x1xf32, #tpu.memory_space<vmem>>, %arg7: memref<2x9x256xf32, #tpu.memory_space<vmem>>) attributes {dimension_semantics = [#tpu.dimension_semantics<parallel>, #tpu.dimension_semantics<parallel>], iteration_bounds = array<i64: 1, 1>, scalar_prefetch = 0 : i64, scratch_operands = 0 : i64, tpu.core_type = #tpu.core_type<tc>, window_params = [{transform_indices = @transform_0, window_bounds = array<i64: 2, 4, 256>}, {pipeline_mode = #tpu.pipeline_mode<synchronous>, transform_indices = @transform_1, window_bounds = array<i64: 8, 4>}, {pipeline_mode = #tpu.pipeline_mode<synchronous>, transform_indices = @transform_2, window_bounds = array<i64: 8, 1>}, {pipeline_mode = #tpu.pipeline_mode<synchronous>, transform_indices = @transform_3, window_bounds = array<i64: 9, 8>}, {pipeline_mode = #tpu.pipeline_mode<synchronous>, transform_indices = @transform_4, window_bounds = array<i64: 9, 1>}, {transform_indices = @transform_5, window_bounds = array<i64: 2, 9, 256>}]} {
    %c0 = arith.constant 0 : index
    %c0_0 = arith.constant 0 : index
    %0 = vector.load %arg3[%c0, %c0_0] : memref<8x4xf32, #tpu.memory_space<vmem>>, vector<8x4xf32>
    %c0_1 = arith.constant 0 : index
    %c0_2 = arith.constant 0 : index
    %1 = vector.load %arg4[%c0_1, %c0_2] : memref<8x1xf32, #tpu.memory_space<vmem>>, vector<8x1xf32>
    %c0_3 = arith.constant 0 : index
    %c0_4 = arith.constant 0 : index
    %2 = vector.load %arg5[%c0_3, %c0_4] : memref<9x8xf32, #tpu.memory_space<vmem>>, vector<9x8xf32>
    %c0_5 = arith.constant 0 : index
    %c0_6 = arith.constant 0 : index
    %3 = vector.load %arg6[%c0_5, %c0_6] : memref<9x1xf32, #tpu.memory_space<vmem>>, vector<9x1xf32>
    %c0_i32 = arith.constant 0 : i32
    %4 = arith.index_cast %c0_i32 : i32 to index
    %c0_7 = arith.constant 0 : index
    %c0_8 = arith.constant 0 : index
    %5 = vector.load %arg2[%4, %c0_7, %c0_8] : memref<2x4x256xf32, #tpu.memory_space<vmem>>, vector<1x4x256xf32>
    %6 = vector.shape_cast %5 : vector<1x4x256xf32> to vector<4x256xf32>
    %cst = arith.constant dense<0.000000e+00> : vector<8x256xf32>
    %7 = tpu.matmul %0, %6, %cst {dimension_numbers = #tpu.dot_dimension_numbers<[1], [0], [0], [1], [0, 0, 1, 1], [], []>, precision = #tpu.contract_precision<fp32>} : vector<8x4xf32>, vector<4x256xf32>, vector<8x256xf32> -> vector<8x256xf32>
    %8 = vector.broadcast %1 : vector<8x1xf32> to vector<8x256xf32>
    %9 = arith.addf %7, %8 : vector<8x256xf32>
    %cst_9 = arith.constant 0.000000e+00 : f32
    %10 = vector.broadcast %cst_9 : f32 to vector<8x256xf32>
    %11 = arith.maximumf %9, %10 : vector<8x256xf32>
    %cst_10 = arith.constant dense<0.000000e+00> : vector<9x256xf32>
    %12 = tpu.matmul %2, %11, %cst_10 {dimension_numbers = #tpu.dot_dimension_numbers<[1], [0], [0], [1], [0, 0, 1, 1], [], []>, precision = #tpu.contract_precision<fp32>} : vector<9x8xf32>, vector<8x256xf32>, vector<9x256xf32> -> vector<9x256xf32>
    %13 = vector.broadcast %3 : vector<9x1xf32> to vector<9x256xf32>
    %14 = arith.addf %12, %13 : vector<9x256xf32>
    %15 = vector.extract_strided_slice %14 {offsets = [8, 0], sizes = [1, 256], strides = [1, 1]} : vector<9x256xf32> to vector<1x256xf32>
    %16 = tpu.iota {dimensions = array<i32: 0>} : vector<9x256xi32>
    %c8_i32 = arith.constant 8 : i32
    %17 = vector.broadcast %c8_i32 : i32 to vector<9x256xi32>
    %18 = arith.cmpi slt, %16, %17 : vector<9x256xi32>
    %19 = arith.negf %15 : vector<1x256xf32>
    %20 = math.exp %19 : vector<1x256xf32>
    %cst_11 = arith.constant 1.000000e+00 : f32
    %21 = vector.broadcast %cst_11 : f32 to vector<1x256xf32>
    %22 = arith.addf %21, %20 : vector<1x256xf32>
    %23 = arith.divf %21, %22 : vector<1x256xf32>
    %cst_12 = arith.constant 1.000000e+00 : f32
    %24 = vector.shape_cast %23 : vector<1x256xf32> to vector<1x256xf32>
    %25 = vector.broadcast %24 : vector<1x256xf32> to vector<9x256xf32>
    %26 = vector.broadcast %cst_12 : f32 to vector<9x256xf32>
    %27 = arith.select %18, %25, %26 : vector<9x256xi1>, vector<9x256xf32>
    %28 = arith.mulf %14, %27 : vector<9x256xf32>
    %29 = arith.index_cast %c0_i32 : i32 to index
    %c0_13 = arith.constant 0 : index
    %c0_14 = arith.constant 0 : index
    %30 = vector.load %arg7[%29, %c0_13, %c0_14] : memref<2x9x256xf32, #tpu.memory_space<vmem>>, vector<1x9x256xf32>
    %31 = vector.shape_cast %30 : vector<1x9x256xf32> to vector<9x256xf32>
    %32 = vector.shape_cast %28 : vector<9x256xf32> to vector<1x9x256xf32>
    tpu.vector_store %arg7[%29, %c0_13, %c0_14], %32 {strides = array<i32>} : memref<2x9x256xf32, #tpu.memory_space<vmem>>, vector<1x9x256xf32>,
    %c1_i32 = arith.constant 1 : i32
    %33 = arith.index_cast %c1_i32 : i32 to index
    %c0_15 = arith.constant 0 : index
    %c0_16 = arith.constant 0 : index
    %34 = vector.load %arg2[%33, %c0_15, %c0_16] : memref<2x4x256xf32, #tpu.memory_space<vmem>>, vector<1x4x256xf32>
    %35 = vector.shape_cast %34 : vector<1x4x256xf32> to vector<4x256xf32>
    %cst_17 = arith.constant dense<0.000000e+00> : vector<8x256xf32>
    %36 = tpu.matmul %0, %35, %cst_17 {dimension_numbers = #tpu.dot_dimension_numbers<[1], [0], [0], [1], [0, 0, 1, 1], [], []>, precision = #tpu.contract_precision<fp32>} : vector<8x4xf32>, vector<4x256xf32>, vector<8x256xf32> -> vector<8x256xf32>
    %37 = vector.broadcast %1 : vector<8x1xf32> to vector<8x256xf32>
    %38 = arith.addf %36, %37 : vector<8x256xf32>
    %cst_18 = arith.constant 0.000000e+00 : f32
    %39 = vector.broadcast %cst_18 : f32 to vector<8x256xf32>
    %40 = arith.maximumf %38, %39 : vector<8x256xf32>
    %cst_19 = arith.constant dense<0.000000e+00> : vector<9x256xf32>
    %41 = tpu.matmul %2, %40, %cst_19 {dimension_numbers = #tpu.dot_dimension_numbers<[1], [0], [0], [1], [0, 0, 1, 1], [], []>, precision = #tpu.contract_precision<fp32>} : vector<9x8xf32>, vector<8x256xf32>, vector<9x256xf32> -> vector<9x256xf32>
    %42 = vector.broadcast %3 : vector<9x1xf32> to vector<9x256xf32>
    %43 = arith.addf %41, %42 : vector<9x256xf32>
    %44 = vector.extract_strided_slice %43 {offsets = [8, 0], sizes = [1, 256], strides = [1, 1]} : vector<9x256xf32> to vector<1x256xf32>
    %45 = tpu.iota {dimensions = array<i32: 0>} : vector<9x256xi32>
    %c8_i32_20 = arith.constant 8 : i32
    %46 = vector.broadcast %c8_i32_20 : i32 to vector<9x256xi32>
    %47 = arith.cmpi slt, %45, %46 : vector<9x256xi32>
    %48 = arith.negf %44 : vector<1x256xf32>
    %49 = math.exp %48 : vector<1x256xf32>
    %cst_21 = arith.constant 1.000000e+00 : f32
    %50 = vector.broadcast %cst_21 : f32 to vector<1x256xf32>
    %51 = arith.addf %50, %49 : vector<1x256xf32>
    %52 = arith.divf %50, %51 : vector<1x256xf32>
    %cst_22 = arith.constant 1.000000e+00 : f32
    %53 = vector.shape_cast %52 : vector<1x256xf32> to vector<1x256xf32>
    %54 = vector.broadcast %53 : vector<1x256xf32> to vector<9x256xf32>
    %55 = vector.broadcast %cst_22 : f32 to vector<9x256xf32>
    %56 = arith.select %47, %54, %55 : vector<9x256xi1>, vector<9x256xf32>
    %57 = arith.mulf %43, %56 : vector<9x256xf32>
    %58 = arith.index_cast %c1_i32 : i32 to index
    %c0_23 = arith.constant 0 : index
    %c0_24 = arith.constant 0 : index
    %59 = vector.load %arg7[%58, %c0_23, %c0_24] : memref<2x9x256xf32, #tpu.memory_space<vmem>>, vector<1x9x256xf32>
    %60 = vector.shape_cast %59 : vector<1x9x256xf32> to vector<9x256xf32>
    %61 = vector.shape_cast %57 : vector<9x256xf32> to vector<1x9x256xf32>
    tpu.vector_store %arg7[%58, %c0_23, %c0_24], %61 {strides = array<i32>} : memref<2x9x256xf32, #tpu.memory_space<vmem>>, vector<1x9x256xf32>,
    %c2_i32 = arith.constant 2 : i32
    return
  }
  func.func @transform_0(%arg0: i32, %arg1: i32) -> (i32, i32, i32) {
    %c0_i32 = arith.constant 0 : i32
    %c0_i32_0 = arith.constant 0 : i32
    return %arg0, %c0_i32, %arg1 : i32, i32, i32
  }
  func.func @transform_1(%arg0: i32, %arg1: i32) -> (i32, i32) {
    %c0_i32 = arith.constant 0 : i32
    %c0_i32_0 = arith.constant 0 : i32
    %c0_i32_1 = arith.constant 0 : i32
    return %c0_i32, %c0_i32_0 : i32, i32
  }
  func.func @transform_2(%arg0: i32, %arg1: i32) -> (i32, i32) {
    %c0_i32 = arith.constant 0 : i32
    %c0_i32_0 = arith.constant 0 : i32
    %c0_i32_1 = arith.constant 0 : i32
    return %c0_i32, %c0_i32_0 : i32, i32
  }
  func.func @transform_3(%arg0: i32, %arg1: i32) -> (i32, i32) {
    %c0_i32 = arith.constant 0 : i32
    %c0_i32_0 = arith.constant 0 : i32
    %c0_i32_1 = arith.constant 0 : i32
    return %c0_i32, %c0_i32_0 : i32, i32
  }
  func.func @transform_4(%arg0: i32, %arg1: i32) -> (i32, i32) {
    %c0_i32 = arith.constant 0 : i32
    %c0_i32_0 = arith.constant 0 : i32
    %c0_i32_1 = arith.constant 0 : i32
    return %c0_i32, %c0_i32_0 : i32, i32
  }
  func.func @transform_5(%arg0: i32, %arg1: i32) -> (i32, i32, i32) {
    %c0_i32 = arith.constant 0 : i32
    %c0_i32_0 = arith.constant 0 : i32
    return %arg0, %c0_i32, %arg1 : i32, i32, i32
  }
}

</mosaic_0001>

<bundles_post_ra>
// kernel: conv_idc_block.2
= control target key start
LH: loop header
LB: loop body
LE: loop exit
PB: predicated region body
PF: predicated region fallthrough
CT: control target
= control target key end

     0   :  { %vm28_vm0 = vcmask 1043456   ;;  %vm24_vm1 = vcmask 31744   ;;  %v1030_v2 = vmov 0.0   ;;  %vm17_vm2 = vcmask 7168   ;;  %s1117_s0 = inlined_call_operand.vmem [shape: f32[2,4,256], index: 0, kind: input, shape index: {}]   ;;  %s1118_s1 = inlined_call_operand.vmem [shape: f32[8,4], index: 1, kind: input, shape index: {}]   ;;  %s1119_s2 = inlined_call_operand.vmem [shape: f32[1,8,1], index: 2, kind: output, shape index: {0}]   ;;  %s1120_s3 = inlined_call_operand.vmem [shape: f32[1,8,1], index: 3, kind: output, shape index: {1}]  }
   0x1   :  { %v21_v0 = vld [vmem:[%s1117_s0] sm:$0xff]  ;;  %v1006_v1 = vld [vmem:[%s1117_s0 + $0x8] sm:$0xff]  ;;  %99 = vmatprep.mubr.f32.mxu0 %v1030_v2  ;;  %582 = vmatprep.mubr.f32.mxu1 %v1030_v2  ;;  %18 = vst.msk [vmem:[%s1119_s2] sm:$0xff] %vm17_vm2, %v1030_v2  ;;  %19 = vst.msk [vmem:[%s1120_s3] sm:$0xff] %vm17_vm2, %v1030_v2 }
   0x2   :  { %v20_v3 = vld [vmem:[%s1118_s1] sm:$0xff]  ;;  %v23_v4 = vcombine.high %v21_v0, %v21_v0  ;;  %v511_v5 = vcombine.high %v1006_v1, %v1006_v1  ;;  %v29_v6 = vsel %vm28_vm0, %v21_v0, 0  ;;  %v512_v7 = vsel %vm28_vm0, %v1006_v1, 0 }
   0x3   :  { %v1064_v8 = vand.u32 4294901760, %v29_v6  ;;  %v1066_v9 = vand.u32 4294901760, %v512_v7  ;;  %v26_v10 = vsel %vm24_vm1, %v20_v3, 0 }
   0x4   :  { %v31_v11 = vsel %vm28_vm0, %v23_v4, 0  ;;  %v514_v12 = vsel %vm28_vm0, %v511_v5, 0  ;;  %v1070_v13 = vand.u32 4294901760, %v26_v10 }
   0x5   :  { %v33_v14 = vand.u32 4294901760, %v31_v11  ;;  %v516_v15 = vand.u32 4294901760, %v514_v12  ;;  %v118_v16 = vsub.f32 %v29_v6, %v1064_v8  ;;  %v601_v17 = vsub.f32 %v512_v7, %v1066_v9 }
   0x6   :  { %v101_v18 = vsub.f32 %v26_v10, %v1070_v13 }
   0x7   :  { %34 = vmatprep.subr.mxu0 %v33_v14  ;;  %517 = vmatprep.subr.mxu1 %v516_v15  ;;  %v112_v19 = vsub.f32 %v31_v11, %v33_v14  ;;  %v595_v20 = vsub.f32 %v514_v12, %v516_v15  ;;  %v119_v21 = vand.u32 4294901760, %v118_v16  ;;  %v602_v22 = vand.u32 4294901760, %v601_v17 }
   0x8   :  { %36 = vmatpush1.msra.mxu0 %v1064_v8  ;;  %519 = vmatpush1.msra.mxu1 %v1066_v9  ;;  %v102_v23 = vand.u32 4294901760, %v101_v18  ;;  %v991_v49 = vld [vmem:[%s1119_s2] sm:$0xff] }
   0x9   :  { %v113_v24 = vand.u32 4294901760, %v112_v19  ;;  %v596_v25 = vand.u32 4294901760, %v595_v20  ;;  %v120_v26 = vsub.f32 %v118_v16, %v119_v21  ;;  %v603_v27 = vsub.f32 %v601_v17, %v602_v22  ;;  %v995_v54 = vld [vmem:[%s1120_s3] sm:$0xff] }
   0xa   :  { %v103_v28 = vsub.f32 %v101_v18, %v102_v23 }
   0xb   :  { %v114_v29 = vsub.f32 %v112_v19, %v113_v24  ;;  %v597_v30 = vsub.f32 %v595_v20, %v596_v25  ;;  %v121_v32 = vand.u32 4294901760, %v120_v26  ;;  %v604_v33 = vand.u32 4294901760, %v603_v27 }
   0xc   :  { %v104_v31 = vand.u32 4294901760, %v103_v28 }
   0xd   :  { %v115_v34 = vand.u32 4294901760, %v114_v29  ;;  %v598_v35 = vand.u32 4294901760, %v597_v30 }
   0xe   :  { %105 = vmatmul.mubr.f32.vlgmr.msra.gmra.mrb[0].mxu0 %v104_v31  ;;  %588 = vmatmul.mubr.f32.vlgmr.msra.gmra.mrb[0].mxu1 %v104_v31 }
   0xf   :  { %116 = vmatprep.subr.mxu0 %v115_v34  ;;  %599 = vmatprep.subr.mxu1 %v598_v35 }
  0x10   :  { %122 = vmatpush1.msra.mxu0 %v121_v32  ;;  %605 = vmatpush1.msra.mxu1 %v604_v33 }
  0x11   :  { %185 = vmatprep.mubr.f32.mxu0 %v1030_v2  ;;  %668 = vmatprep.mubr.f32.mxu1 %v1030_v2 }
  0x12   :  { %195 = vmatprep.subr.mxu0 %v112_v19  ;;  %678 = vmatprep.subr.mxu1 %v595_v20 }
  0x16   :  { %187 = vmatmul.mubr.f32.vlgmr.msra.gmra.mrb[0].mxu0 %v1070_v13  ;;  %670 = vmatmul.mubr.f32.vlgmr.msra.gmra.mrb[0].mxu1 %v1070_v13 }
  0x17   :  { %198 = vmatpush1.msra.mxu0 %v118_v16  ;;  %681 = vmatpush1.msra.mxu1 %v601_v17 }
  0x18   :  { %261 = vmatprep.mubr.f32.mxu0 %v1030_v2  ;;  %744 = vmatprep.mubr.f32.mxu1 %v1030_v2 }
  0x19   :  { %271 = vmatprep.subr.mxu0 %v33_v14  ;;  %754 = vmatprep.subr.mxu1 %v516_v15 }
  0x1e   :  { %264 = vmatmul.mubr.f32.vlgmr.msra.gmra.mrb[0].mxu0 %v101_v18  ;;  %747 = vmatmul.mubr.f32.vlgmr.msra.gmra.mrb[0].mxu1 %v101_v18 }
  0x1f   :  { %273 = vmatpush1.msra.mxu0 %v1064_v8  ;;  %756 = vmatpush1.msra.mxu1 %v1066_v9 }
  0x20   :  { %336 = vmatprep.mubr.f32.mxu0 %v1030_v2  ;;  %819 = vmatprep.mubr.f32.mxu1 %v1030_v2 }
  0x21   :  { %349 = vmatprep.subr.mxu0 %v113_v24  ;;  %832 = vmatprep.subr.mxu1 %v596_v25 }
  0x26   :  { %340 = vmatmul.mubr.f32.vlgmr.msra.gmra.mrb[0].mxu0 %v102_v23  ;;  %823 = vmatmul.mubr.f32.vlgmr.msra.gmra.mrb[0].mxu1 %v102_v23 }
  0x27   :  { %353 = vmatpush1.msra.mxu0 %v119_v21  ;;  %836 = vmatpush1.msra.mxu1 %v602_v22 }
  0x28   :  { %416 = vmatprep.mubr.f32.mxu0 %v1030_v2  ;;  %899 = vmatprep.mubr.f32.mxu1 %v1030_v2 }
  0x29   :  { %425 = vmatprep.subr.mxu0 %v33_v14  ;;  %908 = vmatprep.subr.mxu1 %v516_v15 }
  0x2e   :  { %418 = vmatmul.mubr.f32.vlgmr.msra.gmra.mrb[0].mxu0 %v1070_v13  ;;  %901 = vmatmul.mubr.f32.vlgmr.msra.gmra.mrb[0].mxu1 %v1070_v13 }
  0x2f   :  { %427 = vmatpush1.msra.mxu0 %v1064_v8  ;;  %910 = vmatpush1.msra.mxu1 %v1066_v9 }
  0x30   :  { %490 = vmatprep.mubr.f32.mxu0 %v1030_v2  ;;  %973 = vmatprep.mubr.f32.mxu1 %v1030_v2 }
  0x36   :  { %492 = vmatmul.mubr.f32.vlgmr.msra.gmra.mrb[0].mxu0 %v1070_v13  ;;  %975 = vmatmul.mubr.f32.vlgmr.msra.gmra.mrb[0].mxu1 %v1070_v13 }
 0x109   :  { %v493_v36 = vpop.f32.mrb[0].mxu0  ;;  %v976_v37 = vpop.f32.mrb[0].mxu1 }
 0x10a   :  { %v502_v38 = vmul.f32 %v493_v36, %v493_v36  ;;  %v985_v39 = vmul.f32 %v976_v37, %v976_v37  ;;  %v495_v40 = vpop.f32.mrb[1].mxu0  ;;  %v978_v41 = vpop.f32.mrb[1].mxu1 }
 0x10b   :  { %v503_v42 = vmul.f32 %v495_v40, %v495_v40  ;;  %v986_v43 = vmul.f32 %v978_v41, %v978_v41  ;;  %v981_v44 = vadd.f32 %v978_v41, %v976_v37  ;;  %v498_v45 = vadd.f32 %v495_v40, %v493_v36 }
 0x10d   :  { %982 = vadd.xlane.f32.xlu1 %v981_v44  ;;  %499 = vadd.xlane.f32.xlu0 %v498_v45  ;;  %v987_v46 = vadd.f32 %v986_v43, %v985_v39  ;;  %v504_v47 = vadd.f32 %v503_v42, %v502_v38 }
 0x111   :  { %988 = vadd.xlane.f32.xlu1 %v987_v46  ;;  %505 = vadd.xlane.f32.xlu0 %v504_v47 }
 0x19a   :  { %v983_v48 = vpop.xlane.xlu1 %982  ;;  %v500_v50 = vpop.xlane.xlu0 %499 }
 0x19b   :  { %v984_v51 = vadd.f32 %v983_v48, %v500_v50 }
 0x19d   :  { %v992_v52 = vadd.f32 %v991_v49, %v984_v51 }
 0x19e   :  { %v989_v53 = vpop.xlane.xlu1 %988  ;;  %v506_v55 = vpop.xlane.xlu0 %505 }
 0x19f   :  { %994 = vst.msk [vmem:[%s1119_s2] sm:$0xff] %vm17_vm2, %v992_v52  ;;  %v990_v56 = vadd.f32 %v989_v53, %v506_v55 }
 0x1a1   :  { %v996_v57 = vadd.f32 %v995_v54, %v990_v56 }
 0x1a3   :  { %997 = vst.msk [vmem:[%s1120_s3] sm:$0xff] %vm17_vm2, %v996_v57 }

// kernel: conv_idc_block.3
= control target key start
LH: loop header
LB: loop body
LE: loop exit
PB: predicated region body
PF: predicated region fallthrough
CT: control target
= control target key end

     0   :  { %vm38_vm0 = vcmask 1043456   ;;  %vm34_vm1 = vcmask 31744   ;;  %v2207_v1 = vmov 0.0   ;;  %v2208_v3 = vmov 0   ;;  %s2384_s0 = inlined_call_operand.vmem [shape: f32[2,4,256], index: 0, kind: input, shape index: {}]   ;;  %s2385_s1 = inlined_call_operand.vmem [shape: f32[8,4], index: 1, kind: input, shape index: {}]   ;;  %s2386_s2 = inlined_call_operand.vmem [shape: f32[8,1], index: 2, kind: input, shape index: {}]   ;;  %s2387_s4 = inlined_call_operand.vmem [shape: f32[9,1], index: 4, kind: input, shape index: {}]   ;;  %s2388_s3 = inlined_call_operand.vmem [shape: f32[9,8], index: 3, kind: input, shape index: {}]   ;;  %s2389_s5 = inlined_call_operand.vmem [shape: f32[2,9,256], index: 5, kind: output, shape index: {}]  }
   0x1   :  { %v26_v0 = vld [vmem:[%s2384_s0] sm:$0xff]  ;;  %109 = vmatprep.mubr.f32.mxu0 %v2207_v1  ;;  %2187 = vset.pattern.permute.xlu0 %v2208_v3  ;;  %v25_v11 = vld [vmem:[%s2387_s4 + $0x8] sm:$0x1]  ;;  %vm520_vm2 = vcmask 64512  }
   0x2   :  { %v20_v2 = vld [vmem:[%s2385_s1] sm:$0xff]  ;;  %v33_v4 = vcombine.high %v26_v0, %v26_v0  ;;  %v39_v5 = vsel %vm38_vm0, %v26_v0, 0  ;;  %593 = vmatprep.mubr.f32.mxu1 %v2207_v1  ;;  %2188 = vset.pattern.permute.xlu1 %v2208_v3  ;;  %v2106_v25 = vld [vmem:[%s2384_s0 + $0x8] sm:$0xff] }
   0x3   :  { %v36_v6 = vsel %vm34_vm1, %v20_v2, 0  ;;  %v21_v7 = vld [vmem:[%s2386_s2] sm:$0xff]  ;;  %v45_v8 = vand.u32 4294901760, %v39_v5  ;;  %v1081_v26 = vcombine.high %v2106_v25, %v2106_v25  ;;  %v1082_v29 = vsel %vm38_vm0, %v2106_v25, 0  ;;  %v23_v42 = vld [vmem:[%s2388_s3 + $0x8] sm:$0x1] }
   0x4   :  { %v2251_v9 = vand.u32 4294901760, %v36_v6  ;;  %29 = vperm.xlu0 %2187, %v21_v7   ;;  %v41_v10 = vsel %vm38_vm0, %v33_v4, 0  ;;  %v1088_v30 = vand.u32 4294901760, %v1082_v29  ;;  %v24_v39 = vld [vmem:[%s2387_s4] sm:$0xff]  ;;  %v525_v44 = vsel %vm520_vm2, %v23_v42, 0 }
   0x5   :  { %v43_v12 = vand.u32 4294901760, %v41_v10  ;;  %v128_v13 = vsub.f32 %v39_v5, %v45_v8  ;;  %v1084_v27 = vsel %vm38_vm0, %v1081_v26, 0  ;;  %512 = vperm.xlu1 %2188, %v24_v39   ;;  %v22_v40 = vld [vmem:[%s2388_s3] sm:$0xff]  ;;  %v2295_v46 = vand.u32 4294901760, %v525_v44 }
   0x6   :  { %v111_v14 = vsub.f32 %v36_v6, %v2251_v9  ;;  %v1086_v28 = vand.u32 4294901760, %v1084_v27  ;;  %v1171_v32 = vsub.f32 %v1082_v29, %v1088_v30  ;;  %v522_v41 = vsel %vm520_vm2, %v22_v40, 0 }
   0x7   :  { %44 = vmatprep.subr.mxu0 %v43_v12  ;;  %v122_v16 = vsub.f32 %v41_v10, %v43_v12  ;;  %v129_v17 = vand.u32 4294901760, %v128_v13  ;;  %v2290_v43 = vand.u32 4294901760, %v522_v41  ;;  %v2301_v48 = vsub.f32 %v525_v44, %v2295_v46 }
   0x8   :  { %v112_v15 = vand.u32 4294901760, %v111_v14  ;;  %517 = vperm.xlu0 %2187, %v25_v11   ;;  %46 = vmatpush1.msra.mxu0 %v45_v8  ;;  %v1165_v31 = vsub.f32 %v1084_v27, %v1086_v28  ;;  %v1172_v34 = vand.u32 4294901760, %v1171_v32 }
   0x9   :  { %v123_v19 = vand.u32 4294901760, %v122_v16  ;;  %v130_v20 = vsub.f32 %v128_v13, %v129_v17  ;;  %v2293_v45 = vsub.f32 %v522_v41, %v2290_v43  ;;  %v2306_v55 = vand.u32 4294901760, %v2301_v48 }
   0xa   :  { %v113_v18 = vsub.f32 %v111_v14, %v112_v15  ;;  %v1166_v33 = vand.u32 4294901760, %v1165_v31  ;;  %v1173_v36 = vsub.f32 %v1171_v32, %v1172_v34 }
   0xb   :  { %v124_v22 = vsub.f32 %v122_v16, %v123_v19  ;;  %v131_v23 = vand.u32 4294901760, %v130_v20  ;;  %v2298_v47 = vand.u32 4294901760, %v2293_v45  ;;  %v608_v61 = vsub.f32 %v2301_v48, %v2306_v55 }
   0xc   :  { %v114_v21 = vand.u32 4294901760, %v113_v18  ;;  %v1167_v35 = vsub.f32 %v1165_v31, %v1166_v33  ;;  %v1174_v38 = vand.u32 4294901760, %v1173_v36 }
   0xd   :  { %v125_v24 = vand.u32 4294901760, %v124_v22  ;;  %v597_v54 = vsub.f32 %v2293_v45, %v2298_v47  ;;  %v2313_v2 = vand.u32 4294901760, %v608_v61 }
   0xe   :  { %115 = vmatmul.mubr.f32.vlgmr.msra.gmra.mrb[0].mxu0 %v114_v21  ;;  %v1168_v37 = vand.u32 4294901760, %v1167_v35  ;;  %v1058_v35 = vlaneseq }
   0xf   :  { %195 = vmatprep.mubr.f32.mxu0 %v2207_v1  ;;  %126 = vmatprep.subr.mxu0 %v125_v24  ;;  %v2308_v60 = vand.u32 4294901760, %v597_v54 }
  0x10   :  { %132 = vmatpush1.msra.mxu0 %v131_v23  ;;  %v1059_v41 = vshrl.u32 %v1058_v35, 7 }
  0x11   :  { %205 = vmatprep.subr.mxu0 %v122_v16 }
  0x16   :  { %197 = vmatmul.mubr.f32.vlgmr.msra.gmra.mrb[0].mxu0 %v2251_v9 }
  0x17   :  { %208 = vmatpush1.msra.mxu0 %v128_v13  ;;  %271 = vmatprep.mubr.f32.mxu0 %v2207_v1 }
  0x18   :  { %281 = vmatprep.subr.mxu0 %v43_v12 }
  0x1e   :  { %274 = vmatmul.mubr.f32.vlgmr.msra.gmra.mrb[0].mxu0 %v111_v14 }
  0x1f   :  { %283 = vmatpush1.msra.mxu0 %v45_v8  ;;  %346 = vmatprep.mubr.f32.mxu0 %v2207_v1 }
  0x20   :  { %359 = vmatprep.subr.mxu0 %v123_v19 }
  0x26   :  { %350 = vmatmul.mubr.f32.vlgmr.msra.gmra.mrb[0].mxu0 %v112_v15 }
  0x27   :  { %363 = vmatpush1.msra.mxu0 %v129_v17  ;;  %426 = vmatprep.mubr.f32.mxu0 %v2207_v1 }
  0x28   :  { %435 = vmatprep.subr.mxu0 %v43_v12 }
  0x2e   :  { %428 = vmatmul.mubr.f32.vlgmr.msra.gmra.mrb[0].mxu0 %v2251_v9 }
  0x2f   :  { %437 = vmatpush1.msra.mxu0 %v45_v8  ;;  %500 = vmatprep.mubr.f32.mxu0 %v2207_v1 }
  0x30   :  { %1087 = vmatprep.subr.mxu0 %v1086_v28 }
  0x36   :  { %502 = vmatmul.mubr.f32.vlgmr.msra.gmra.mrb[0].mxu0 %v2251_v9 }
  0x37   :  { %1089 = vmatpush1.msra.mxu0 %v1088_v30  ;;  %1152 = vmatprep.mubr.f32.mxu0 %v2207_v1 }
  0x38   :  { %1169 = vmatprep.subr.mxu0 %v1168_v37 }
  0x3a   :  { %1158 = vmatmul.mubr.f32.vlgmr.msra.gmra.mrb[2].mxu0 %v114_v21 }
  0x3b   :  { %1175 = vmatpush1.msra.mxu0 %v1174_v38  ;;  %1238 = vmatprep.mubr.f32.mxu0 %v2207_v1 }
  0x3c   :  { %1248 = vmatprep.subr.mxu0 %v1165_v31 }
  0x42   :  { %1240 = vmatmul.mubr.f32.vlgmr.msra.gmra.mrb[2].mxu0 %v2251_v9 }
  0x43   :  { %1251 = vmatpush1.msra.mxu0 %v1171_v32  ;;  %1314 = vmatprep.mubr.f32.mxu0 %v2207_v1 }
  0x44   :  { %1324 = vmatprep.subr.mxu0 %v1086_v28 }
  0x4a   :  { %1317 = vmatmul.mubr.f32.vlgmr.msra.gmra.mrb[2].mxu0 %v111_v14 }
  0x4b   :  { %1326 = vmatpush1.msra.mxu0 %v1088_v30  ;;  %1389 = vmatprep.mubr.f32.mxu0 %v2207_v1 }
  0x4c   :  { %1402 = vmatprep.subr.mxu0 %v1166_v33 }
  0x52   :  { %1393 = vmatmul.mubr.f32.vlgmr.msra.gmra.mrb[2].mxu0 %v112_v15 }
  0x53   :  { %1406 = vmatpush1.msra.mxu0 %v1172_v34  ;;  %1469 = vmatprep.mubr.f32.mxu0 %v2207_v1 }
  0x54   :  { %1478 = vmatprep.subr.mxu0 %v1086_v28 }
  0x5a   :  { %1471 = vmatmul.mubr.f32.vlgmr.msra.gmra.mrb[2].mxu0 %v2251_v9 }
  0x5b   :  { %1480 = vmatpush1.msra.mxu0 %v1088_v30  ;;  %1543 = vmatprep.mubr.f32.mxu0 %v2207_v1 }
  0x62   :  { %1545 = vmatmul.mubr.f32.vlgmr.msra.gmra.mrb[2].mxu0 %v2251_v9 }
  0x63   :  { %1882 = vmatprep.mubr.f32.mxu0 %v2207_v1 }
  0x83   :  { %v30_v49 = vpop.permute.xlu0 %29 }
  0x84   :  { %v513_v39 = vpop.permute.xlu1 %512 }
  0x87   :  { %v518_v26 = vpop.permute.xlu0 %517 }
 0x109   :  { %v503_v50 = vpop.f32.mrb[0].mxu0 }
 0x10a   :  { %v2113_v51 = vadd.f32 %v503_v50, %v30_v49  ;;  %v505_v52 = vpop.f32.mrb[1].mxu0  ;;  %v1060_v50 = vsub.s32 0, %v1059_v41 }
 0x10b   :  { %v2114_v53 = vadd.f32 %v505_v52, %v30_v49 }
 0x10c   :  { %v508_v56 = vmax.f32 %v2113_v51, 0.0 }
 0x10d   :  { %v509_v57 = vmax.f32 %v2114_v53, 0.0 }
 0x10e   :  { %v529_v58 = vand.u32 4294901760, %v508_v56 }
 0x10f   :  { %v527_v59 = vand.u32 4294901760, %v509_v57 }
 0x110   :  { %v623_v62 = vsub.f32 %v508_v56, %v529_v58 }
 0x111   :  { %v617_v63 = vsub.f32 %v509_v57, %v527_v59  ;;  %528 = vmatprep.subr.mxu1 %v527_v59 }
 0x112   :  { %v624_v0 = vand.u32 4294901760, %v623_v62  ;;  %530 = vmatpush1.msra.mxu1 %v529_v58 }
 0x113   :  { %599 = vmatmul.mubr.f32.vlgmr.msra.gmra.mrb[0].mxu1 %v2308_v60  ;;  %v618_v3 = vand.u32 4294901760, %v617_v63 }
 0x114   :  { %v625_v4 = vsub.f32 %v623_v62, %v624_v0  ;;  %604 = vmatprep.mubr.f32.mxu1 %v2207_v1 }
 0x115   :  { %v619_v5 = vsub.f32 %v617_v63, %v618_v3 }
 0x116   :  { %v626_v7 = vand.u32 4294901760, %v625_v4 }
 0x117   :  { %610 = vmatmul.mubr.f32.gmra.mrb[2].mxu1 %v2313_v2  ;;  %v620_v6 = vand.u32 4294901760, %v619_v5 }
 0x118   :  { %690 = vmatprep.mubr.f32.mxu1 %v2207_v1 }
 0x119   :  { %621 = vmatprep.subr.mxu1 %v620_v6 }
 0x11a   :  { %627 = vmatpush1.msra.mxu1 %v626_v7 }
 0x11b   :  { %692 = vmatmul.mubr.f32.vlgmr.msra.gmra.mrb[0].mxu1 %v2290_v43  ;;  %707 = vmatprep.subr.mxu1 %v617_v63 }
 0x11c   :  { %710 = vmatpush1.msra.mxu1 %v623_v62  ;;  %697 = vmatprep.mubr.f32.mxu1 %v2207_v1 }
 0x11d   :  { %791 = vmatprep.subr.mxu1 %v527_v59 }
 0x11f   :  { %699 = vmatmul.mubr.f32.gmra.mrb[2].mxu1 %v2295_v46 }
 0x120   :  { %773 = vmatprep.mubr.f32.mxu1 %v2207_v1 }
 0x123   :  { %776 = vmatmul.mubr.f32.vlgmr.msra.gmra.mrb[0].mxu1 %v2293_v45 }
 0x124   :  { %793 = vmatpush1.msra.mxu1 %v529_v58  ;;  %781 = vmatprep.mubr.f32.mxu1 %v2207_v1 }
 0x125   :  { %878 = vmatprep.subr.mxu1 %v618_v3 }
 0x127   :  { %784 = vmatmul.mubr.f32.gmra.mrb[2].mxu1 %v2301_v48 }
 0x128   :  { %856 = vmatprep.mubr.f32.mxu1 %v2207_v1 }
 0x12b   :  { %860 = vmatmul.mubr.f32.vlgmr.msra.gmra.mrb[0].mxu1 %v2298_v47 }
 0x12c   :  { %882 = vmatpush1.msra.mxu1 %v624_v0  ;;  %865 = vmatprep.mubr.f32.mxu1 %v2207_v1 }
 0x12d   :  { %961 = vmatprep.subr.mxu1 %v527_v59 }
 0x12f   :  { %869 = vmatmul.mubr.f32.gmra.mrb[2].mxu1 %v2306_v55 }
 0x130   :  { %945 = vmatprep.mubr.f32.mxu1 %v2207_v1 }
 0x133   :  { %947 = vmatmul.mubr.f32.vlgmr.msra.gmra.mrb[0].mxu1 %v2290_v43 }
 0x134   :  { %963 = vmatpush1.msra.mxu1 %v529_v58  ;;  %952 = vmatprep.mubr.f32.mxu1 %v2207_v1 }
 0x135   :  { %v1546_v8 = vpop.f32.mrb[2].mxu0 }
 0x136   :  { %v2119_v9 = vadd.f32 %v1546_v8, %v30_v49  ;;  %v1548_v10 = vpop.f32.mrb[3].mxu0 }
 0x137   :  { %v2120_v11 = vadd.f32 %v1548_v10, %v30_v49  ;;  %954 = vmatmul.mubr.f32.gmra.mrb[2].mxu1 %v2295_v46 }
 0x138   :  { %v1551_v12 = vmax.f32 %v2119_v9, 0.0  ;;  %1026 = vmatprep.mubr.f32.mxu1 %v2207_v1 }
 0x139   :  { %v1552_v13 = vmax.f32 %v2120_v11, 0.0 }
 0x13a   :  { %v1555_v14 = vand.u32 4294901760, %v1551_v12 }
 0x13b   :  { %v1553_v15 = vand.u32 4294901760, %v1552_v13  ;;  %1028 = vmatmul.mubr.f32.vlgmr.msra.gmra.mrb[0].mxu1 %v2290_v43 }
 0x13c   :  { %v1649_v16 = vsub.f32 %v1551_v12, %v1555_v14  ;;  %1033 = vmatprep.mubr.f32.mxu1 %v2207_v1 }
 0x13d   :  { %v1643_v17 = vsub.f32 %v1552_v13, %v1553_v15  ;;  %1554 = vmatprep.subr.mxu1 %v1553_v15  ;;  %1817 = vmatprep.subr.mxu0 %v1553_v15 }
 0x13e   :  { %v1650_v18 = vand.u32 4294901760, %v1649_v16  ;;  %1556 = vmatpush1.msra.mxu1 %v1555_v14  ;;  %1819 = vmatpush1.msra.mxu0 %v1555_v14 }
 0x13f   :  { %1035 = vmatmul.mubr.f32.gmra.mrb[2].mxu1 %v2295_v46  ;;  %1886 = vmatmul.mubr.f32.vlgmr.msra.gmra.mrb[4].mxu0 %v2298_v47  ;;  %v1644_v19 = vand.u32 4294901760, %v1643_v17 }
 0x140   :  { %v1651_v20 = vsub.f32 %v1649_v16, %v1650_v18  ;;  %1619 = vmatprep.mubr.f32.mxu1 %v2207_v1  ;;  %1891 = vmatprep.mubr.f32.mxu0 %v2207_v1 }
 0x141   :  { %1904 = vmatprep.subr.mxu0 %v1644_v19  ;;  %v1645_v21 = vsub.f32 %v1643_v17, %v1644_v19 }
 0x142   :  { %1908 = vmatpush1.msra.mxu0 %v1650_v18  ;;  %v1652_v23 = vand.u32 4294901760, %v1651_v20 }
 0x143   :  { %1625 = vmatmul.mubr.f32.vlgmr.msra.gmra.mrb[4].mxu1 %v2308_v60  ;;  %1895 = vmatmul.mubr.f32.gmra.mrb[6].mxu0 %v2306_v55  ;;  %v1646_v22 = vand.u32 4294901760, %v1645_v21 }
 0x144   :  { %1987 = vmatprep.subr.mxu0 %v1553_v15  ;;  %1630 = vmatprep.mubr.f32.mxu1 %v2207_v1 }
 0x145   :  { %1647 = vmatprep.subr.mxu1 %v1646_v22  ;;  %1971 = vmatprep.mubr.f32.mxu0 %v2207_v1 }
 0x146   :  { %1653 = vmatpush1.msra.mxu1 %v1652_v23 }
 0x147   :  { %1636 = vmatmul.mubr.f32.gmra.mrb[6].mxu1 %v2313_v2  ;;  %1733 = vmatprep.subr.mxu1 %v1643_v17 }
 0x148   :  { %1973 = vmatmul.mubr.f32.vlgmr.msra.gmra.mrb[4].mxu0 %v2290_v43  ;;  %1716 = vmatprep.mubr.f32.mxu1 %v2207_v1 }
 0x149   :  { %1989 = vmatpush1.msra.mxu0 %v1555_v14  ;;  %1978 = vmatprep.mubr.f32.mxu0 %v2207_v1 }
 0x14b   :  { %1718 = vmatmul.mubr.f32.vlgmr.msra.gmra.mrb[4].mxu1 %v2290_v43 }
 0x14c   :  { %1736 = vmatpush1.msra.mxu1 %v1649_v16  ;;  %1980 = vmatmul.mubr.f32.gmra.mrb[6].mxu0 %v2295_v46 }
 0x14d   :  { %1723 = vmatprep.mubr.f32.mxu1 %v2207_v1  ;;  %2052 = vmatprep.mubr.f32.mxu0 %v2207_v1 }
 0x14f   :  { %1725 = vmatmul.mubr.f32.gmra.mrb[6].mxu1 %v2295_v46 }
 0x150   :  { %2054 = vmatmul.mubr.f32.vlgmr.msra.gmra.mrb[4].mxu0 %v2290_v43  ;;  %1799 = vmatprep.mubr.f32.mxu1 %v2207_v1 }
 0x151   :  { %2059 = vmatprep.mubr.f32.mxu0 %v2207_v1 }
 0x153   :  { %1802 = vmatmul.mubr.f32.vlgmr.msra.gmra.mrb[4].mxu1 %v2293_v45 }
 0x154   :  { %2061 = vmatmul.mubr.f32.gmra.mrb[6].mxu0 %v2295_v46  ;;  %1807 = vmatprep.mubr.f32.mxu1 %v2207_v1 }
 0x157   :  { %1810 = vmatmul.mubr.f32.gmra.mrb[6].mxu1 %v2301_v48 }
 0x20e   :  { %v1029_v24 = vpop.f32.mrb[0].mxu1 }
 0x20f   :  { %v1031_v25 = vpop.f32.mrb[1].mxu1  ;;  %v2115_v58 = vadd.f32 %v1029_v24, %v513_v39 }
 0x210   :  { %v2116_v61 = vadd.f32 %v1031_v25, %v513_v39 }
 0x212   :  { %v1036_v27 = vpop.f32.mrb[2].mxu1 }
 0x213   :  { %v2117_v28 = vadd.f32 %v1036_v27, %v518_v26  ;;  %v1038_v29 = vpop.f32.mrb[3].mxu1 }
 0x214   :  { %v2118_v30 = vadd.f32 %v1038_v29, %v518_v26 }
 0x215   :  { %v2104_v31 = vmul.f32 -1.442695, %v2117_v28  ;;  %1076 = vst [vmem:[%s2389_s5 + $0x10] sm:$0x1] %v2117_v28 }
 0x216   :  { %v2105_v32 = vmul.f32 -1.442695, %v2118_v30  ;;  %1077 = vst [vmem:[%s2389_s5 + $0x18] sm:$0x1] %v2118_v30 }
 0x217   :  { %2191 = vpow2.f32 %v2104_v31 }
 0x218   :  { %2193 = vpow2.f32 %v2105_v32 }
 0x221   :  { %v2192_v1 = vpop.eup %2191 }
 0x222   :  { %v2194_v33 = vpop.eup %2193  ;;  %v1052_v34 = vadd.f32 1.0, %v2192_v1 }
 0x223   :  { %v1053_v36 = vadd.f32 1.0, %v2194_v33  ;;  %v2055_v37 = vpop.f32.mrb[4].mxu0 }
 0x224   :  { %2195 = vrcp.f32 %v1052_v34  ;;  %v2057_v38 = vpop.f32.mrb[5].mxu0 }
 0x225   :  { %2197 = vrcp.f32 %v1053_v36 }
 0x226   :  { %v1803_v40 = vpop.f32.mrb[4].mxu1 }
 0x227   :  { %v2121_v42 = vadd.f32 %v1803_v40, %v513_v39  ;;  %v2062_v43 = vpop.f32.mrb[6].mxu0  ;;  %v1805_v44 = vpop.f32.mrb[5].mxu1 }
 0x228   :  { %v2123_v45 = vadd.f32 %v1805_v44, %v513_v39  ;;  %v2064_v46 = vpop.f32.mrb[7].mxu0 }
 0x229   :  { %v2122_v47 = vadd.f32 %v2121_v42, %v2055_v37 }
 0x22a   :  { %v2124_v48 = vadd.f32 %v2123_v45, %v2057_v38  ;;  %v1811_v49 = vpop.f32.mrb[6].mxu1 }
 0x22b   :  { %v2125_v51 = vadd.f32 %v1811_v49, %v518_v26  ;;  %v1813_v52 = vpop.f32.mrb[7].mxu1 }
 0x22c   :  { %v2127_v53 = vadd.f32 %v1813_v52, %v518_v26 }
 0x22d   :  { %v2126_v54 = vadd.f32 %v2125_v51, %v2062_v43 }
 0x22e   :  { %v2196_v55 = vpop.eup %2195  ;;  %v2128_v56 = vadd.f32 %v2127_v53, %v2064_v46 }
 0x22f   :  { %v2198_v57 = vpop.eup %2197  ;;  %v1061_v59 = vrot.slane %v2196_v55, %v1060_v50  ;;  %v2107_v60 = vmul.f32 -1.442695, %v2126_v54  ;;  %2111 = vst [vmem:[%s2389_s5 + $0x30] sm:$0x1] %v2126_v54 }
 0x230   :  { %v1065_v62 = vrot.slane %v2198_v57, %v1060_v50  ;;  %v2108_v63 = vmul.f32 -1.442695, %v2128_v56  ;;  %2112 = vst [vmem:[%s2389_s5 + $0x38] sm:$0x1] %v2128_v56 }
 0x231   :  { %v1070_v0 = vmul.f32 %v2115_v58, %v1061_v59  ;;  %2199 = vpow2.f32 %v2107_v60 }
 0x232   :  { %v1071_v2 = vmul.f32 %v2116_v61, %v1065_v62  ;;  %2201 = vpow2.f32 %v2108_v63 }
 0x233   :  { %1074 = vst [vmem:[%s2389_s5] sm:$0xff] %v1070_v0 }
 0x234   :  { %1075 = vst [vmem:[%s2389_s5 + $0x8] sm:$0xff] %v1071_v2 }
 0x23b   :  { %v2200_v3 = vpop.eup %2199 }
 0x23c   :  { %v2202_v4 = vpop.eup %2201  ;;  %v2073_v5 = vadd.f32 1.0, %v2200_v3 }
 0x23d   :  { %v2074_v6 = vadd.f32 1.0, %v2202_v4 }
 0x23e   :  { %2203 = vrcp.f32 %v2073_v5 }
 0x23f   :  { %2205 = vrcp.f32 %v2074_v6 }
 0x248   :  { %v2204_v7 = vpop.eup %2203 }
 0x249   :  { %v2206_v8 = vpop.eup %2205  ;;  %v2082_v9 = vrot.slane %v2204_v7, %v1060_v50 }
 0x24a   :  { %v2086_v10 = vrot.slane %v2206_v8, %v1060_v50 }
 0x24b   :  { %v2091_v11 = vmul.f32 %v2122_v47, %v2082_v9 }
 0x24c   :  { %v2092_v12 = vmul.f32 %v2124_v48, %v2086_v10 }
 0x24d   :  { %2109 = vst [vmem:[%s2389_s5 + $0x20] sm:$0xff] %v2091_v11 }
 0x24e   :  { %2110 = vst [vmem:[%s2389_s5 + $0x28] sm:$0xff] %v2092_v12 }

</bundles_post_ra>
